<compile_context>
chip_gen: v7x
topology: tpu7x:2x2x1
jax: 0.10.0
libtpu: 0.0.40
codegen_flags: <defaults>
</compile_context>

<pallas_src>
import jax
import jax.numpy as jnp
from jax.experimental import pallas as pl
from jax.experimental.pallas import tpu as pltpu

_LN_EPS = 1e-5  # PyTorch nn.LayerNorm default


# ----------------------------- kernels --------------------------------------


def _layernorm_f32(x_ref, g_ref, beta_ref):
    """LayerNorm over the last dim in f32. Returns (x_f32, normalized)."""
    x = x_ref[...].astype(jnp.float32)
    mean = jnp.mean(x, axis=-1, keepdims=True)
    cen = x - mean
    var = jnp.mean(cen * cen, axis=-1, keepdims=True)
    xn = cen * jax.lax.rsqrt(var + _LN_EPS)
    xn = xn * g_ref[...].astype(jnp.float32) + beta_ref[...].astype(jnp.float32)
    return x, xn


def _mlp_chunk(xn_ref, w1_ref, b1_ref, w2_ref):
    """One streamed 4H slab: fc1 chunk + bias + ReLU, then fc2 chunk (f32 acc)."""
    h = jnp.dot(xn_ref[...], w1_ref[...], preferred_element_type=jnp.float32)
    h = jnp.maximum(h + b1_ref[...].astype(jnp.float32), 0.0)
    return jnp.dot(h.astype(w2_ref.dtype), w2_ref[...],
                   preferred_element_type=jnp.float32)


def _resblock_kernel_out_acc(x_ref, g_ref, beta_ref, w1_ref, b1_ref, w2_ref,
                             b2_ref, o_ref, xn_ref):
    """f32 output: accumulate directly into the VMEM-resident output block."""
    k = pl.program_id(1)

    @pl.when(k == 0)
    def _():
        x, xn = _layernorm_f32(x_ref, g_ref, beta_ref)
        xn_ref[...] = xn.astype(xn_ref.dtype)            # bf16 cache for the MXU
        # Seed the output block with residual + fc2 bias; partial fc2 sums are
        # then accumulated into it across the k axis (block index is (i, 0)).
        o_ref[...] = x + b2_ref[...].astype(jnp.float32)

    o_ref[...] += _mlp_chunk(xn_ref, w1_ref, b1_ref, w2_ref)


def _resblock_kernel_scratch_acc(x_ref, g_ref, beta_ref, w1_ref, b1_ref, w2_ref,
                                 b2_ref, o_ref, xn_ref, acc_ref):
    """Non-f32 output: accumulate in an f32 VMEM scratch, cast once at the end."""
    k = pl.program_id(1)

    @pl.when(k == 0)
    def _():
        x, xn = _layernorm_f32(x_ref, g_ref, beta_ref)
        xn_ref[...] = xn.astype(xn_ref.dtype)
        acc_ref[...] = x + b2_ref[...].astype(jnp.float32)   # residual + fc2 bias

    acc_ref[...] += _mlp_chunk(xn_ref, w1_ref, b1_ref, w2_ref)

    @pl.when(k == pl.num_programs(1) - 1)
    def _():
        o_ref[...] = acc_ref[...].astype(o_ref.dtype)


# ----------------------------- wrapper ---------------------------------------


def _pick_tile(n, candidates):
    for c in candidates:
        if n % c == 0:
            return c
    return n


def _round_up(n, m):
    return ((n + m - 1) // m) * m


def _round_down(n, m):
    return (n // m) * m


def residual_block(x, gamma, beta, w1, b1, w2, b2, *, tile_b=None, tile_k=None,
                   compute_dtype=jnp.bfloat16, weight_buffers=2):
    """Fused ResidualBlock forward.

    x: (B, H). w1: (H, 4H) (torch fc1.weight transposed), w2: (4H, H).
    Matmuls run in `compute_dtype` on the MXU; LayerNorm / bias / ReLU /
    residual / accumulation stay f32.
    """
    B, H = x.shape
    H4 = w1.shape[1]
    assert w1.shape == (H, H4) and w2.shape == (H4, H)
    assert b1.shape == (H4,) and b2.shape == (H,)
    assert gamma.shape == (H,) and beta.shape == (H,)

    itm = x.dtype.itemsize                      # x and out share a dtype
    wsz = jnp.dtype(compute_dtype).itemsize
    acc_in_out = (x.dtype == jnp.float32)       # accumulate straight into o_ref

    # ---- hardware-aware VMEM budget ----------------------------------------
    try:
        vmem_cap = int(pltpu.get_tpu_info().vmem_capacity_bytes)
    except Exception:
        vmem_cap = 64 << 20                     # conservative (v7x-sized) fallback
    vmem_budget = min(int(vmem_cap * 0.8), vmem_cap - (12 << 20))
    small_vmem = vmem_cap <= (96 << 20)         # v7x-like: 64 MiB VMEM, 2 TCs/chip

    # ---- 4H (k) axis: collapse when the weights fit comfortably ------------
    weight_bytes = 2 * H * H4 * wsz
    if tile_k is None:
        collapse_thresh = (12 << 20) if small_vmem else (16 << 20)
        if weight_bytes <= collapse_thresh:
            tile_k = H4                          # nk == 1: no streaming overhead
        else:
            tile_k = _pick_tile(H4, (512, 256, 128))
    assert H4 % tile_k == 0, "4H must be divisible by tile_k"
    nk = H4 // tile_k

    # ---- batch axis: as large as the remaining VMEM budget allows ----------
    fixed = (2 * (H * tile_k + tile_k * H) * wsz      # double-buffered weight slabs
             + 2 * 8 * (tile_k + 3 * H) * 4)          # small per-feature params
    per_row = (2 + 2) * H * itm + H * wsz + (0 if acc_in_out else 4 * H)
    rows_budget = max(8, _round_down((vmem_budget - fixed - (2 << 20)) // per_row, 8))
    if tile_b is None:
        if B <= 8:
            tile_b = B
        else:
            # On 2-TC chips make sure nb >= 2 so the "parallel" axis shards.
            want = -(-B // 2) if (small_vmem and B >= 16) else B
            tile_b = int(min(min(rows_budget, 1024), _round_up(want, 8)))
    B_pad = _round_up(B, tile_b)
    assert tile_b == B_pad or tile_b % 8 == 0
    nb = B_pad // tile_b

    # ---- operand prep (weight cast is a no-op when already compute_dtype) --
    x_in = jnp.pad(x, ((0, B_pad - B), (0, 0))) if B_pad != B else x
    w1c = w1 if w1.dtype == compute_dtype else w1.astype(compute_dtype)
    w2c = w2 if w2.dtype == compute_dtype else w2.astype(compute_dtype)
    gamma2 = gamma.reshape(1, H).astype(jnp.float32)
    beta2 = beta.reshape(1, H).astype(jnp.float32)
    b1_2 = b1.reshape(1, H4).astype(jnp.float32)
    b2_2 = b2.reshape(1, H).astype(jnp.float32)

    # ---- VMEM limit from the actual tiles, clamped to the chip budget ------
    est = (2 * tile_b * H * itm                        # x blocks
           + 2 * tile_b * H * itm                      # out blocks
           + max(2, weight_buffers) * (H * tile_k + tile_k * H) * wsz
           + 2 * 8 * (tile_k + 3 * H) * 4              # biases / gamma / beta
           + tile_b * H * wsz                          # LayerNorm cache
           + (0 if acc_in_out else tile_b * H * 4))    # f32 accumulator
    vmem_limit = int(min(max(int(1.25 * est) + (2 << 20), 32 << 20), vmem_budget))

    # ---- specs / kernel selection -------------------------------------------
    w_pipe = {}
    if weight_buffers > 2 and nk > 1:                  # optional deeper weight DMA
        w_pipe["pipeline_mode"] = pl.Buffered(weight_buffers)

    in_specs = [
        pl.BlockSpec((tile_b, H), lambda i, k: (i, 0)),        # x tile
        pl.BlockSpec((1, H), lambda i, k: (0, 0)),             # gamma
        pl.BlockSpec((1, H), lambda i, k: (0, 0)),             # beta
        pl.BlockSpec((H, tile_k), lambda i, k: (0, k), **w_pipe),   # w1 slab
        pl.BlockSpec((1, tile_k), lambda i, k: (0, k)),        # b1 slab
        pl.BlockSpec((tile_k, H), lambda i, k: (k, 0), **w_pipe),   # w2 slab
        pl.BlockSpec((1, H), lambda i, k: (0, 0)),             # b2
    ]
    scratch = [pltpu.VMEM((tile_b, H), compute_dtype)]         # cached LayerNorm(x)
    kernel = _resblock_kernel_out_acc
    if not acc_in_out:
        scratch.append(pltpu.VMEM((tile_b, H), jnp.float32))   # fc2 accumulator
        kernel = _resblock_kernel_scratch_acc

    out = pl.pallas_call(
        kernel,
        out_shape=jax.ShapeDtypeStruct((B_pad, H), x.dtype),
        grid_spec=pltpu.PrefetchScalarGridSpec(
            num_scalar_prefetch=0,
            grid=(nb, nk),                                     # 4H axis innermost
            in_specs=in_specs,
            out_specs=pl.BlockSpec((tile_b, H), lambda i, k: (i, 0)),
            scratch_shapes=scratch,
        ),
        compiler_params=pltpu.CompilerParams(
            dimension_semantics=("parallel", "arbitrary"),
            vmem_limit_bytes=vmem_limit,
        ),
    )(x_in, gamma2, beta2, w1c, b1_2, w2c, b2_2)
    return out[:B] if B_pad != B else out


# ----------------------------- params / reference ---------------------------


def init_params(key, hidden_dim, *, weight_dtype=jnp.bfloat16,
                param_dtype=jnp.float32):
    """Shapes match the module; kaiming_normal_(fan_in, relu) -> std = sqrt(2/fan_in).

    Matmul weights are stored in `weight_dtype` (bf16) once at init so the hot
    path never re-casts them (they are the MXU operands anyway).
    """
    k1, k2 = jax.random.split(key, 2)
    h4 = hidden_dim * 4
    std1 = (2.0 / hidden_dim) ** 0.5      # torch fc1.weight (4H, H), fan_in = H
    w1 = (jax.random.normal(k1, (hidden_dim, h4), jnp.float32) * std1).astype(weight_dtype)
    std2 = (2.0 / h4) ** 0.5              # torch fc2.weight (H, 4H), fan_in = 4H
    w2 = (jax.random.normal(k2, (h4, hidden_dim), jnp.float32) * std2).astype(weight_dtype)
    b1 = jnp.zeros((h4,), param_dtype)    # deterministic zeros (torch uses uniform)
    b2 = jnp.zeros((hidden_dim,), param_dtype)
    gamma = jnp.ones((hidden_dim,), param_dtype)
    beta = jnp.zeros((hidden_dim,), param_dtype)
    return gamma, beta, w1, b1, w2, b2


def _reference(x, gamma, beta, w1, b1, w2, b2):
    """Pure-JAX reference mirroring the kernel's bf16-matmul / f32-elsewhere numerics."""
    xf = x.astype(jnp.float32)
    mean = jnp.mean(xf, axis=-1, keepdims=True)
    var = jnp.mean((xf - mean) ** 2, axis=-1, keepdims=True)
    xn = (xf - mean) * jax.lax.rsqrt(var + _LN_EPS) * gamma.astype(jnp.float32) \
        + beta.astype(jnp.float32)
    h = jnp.dot(xn.astype(jnp.bfloat16), w1.astype(jnp.bfloat16),
                preferred_element_type=jnp.float32) + b1.astype(jnp.float32)
    h = jnp.maximum(h, 0.0)
    y = jnp.dot(h.astype(jnp.bfloat16), w2.astype(jnp.bfloat16),
                preferred_element_type=jnp.float32) + b2.astype(jnp.float32)
    return (xf + y).astype(x.dtype)


if __name__ == "__main__":
    key = jax.random.PRNGKey(0)
    keys = jax.random.split(key, 6)

    # 1) Tiny shape matching the module spec (hidden=32 -> fc1 is 32 -> 128);
    #    the 4H axis collapses (nk == 1) and the f32 out-accumulate path runs.
    x1 = jax.random.normal(keys[0], (8, 32), jnp.float32)
    p1 = init_params(keys[1], 32)
    o1 = jax.block_until_ready(residual_block(x1, *p1))
    r1 = _reference(x1, *p1)
    assert o1.shape == x1.shape
    assert jnp.allclose(o1, r1, atol=5e-3, rtol=5e-3), "mismatch (collapsed-k)"

    # 2) Forced-streamed 4H axis (tile_k=256 -> 4 k-steps) plus a ragged batch
    #    (B=20) exercising the zero-pad / slice path.
    x2 = jax.random.normal(keys[2], (20, 256), jnp.float32)
    p2 = init_params(keys[3], 256)
    o2 = jax.block_until_ready(residual_block(x2, *p2, tile_k=256))
    r2 = _reference(x2, *p2)
    assert o2.shape == x2.shape
    assert jnp.allclose(o2, r2, atol=5e-3, rtol=5e-3), "mismatch (streamed-k)"

    # 3) bf16 activations -> f32 scratch-accumulator variant.
    x3 = jax.random.normal(keys[4], (16, 128), jnp.float32).astype(jnp.bfloat16)
    p3 = init_params(keys[5], 128)
    o3 = jax.block_until_ready(residual_block(x3, *p3))
    r3 = _reference(x3, *p3)
    assert o3.shape == x3.shape
    assert jnp.allclose(o3.astype(jnp.float32), r3.astype(jnp.float32),
                        atol=3e-2, rtol=3e-2), "mismatch (bf16 output)"

    print("KERNEL_OK")
</pallas_src>

<mosaic_0001>
module attributes {stable_mosaic.version = 11 : i64} {
  func.func @_resblock_kernel_out_acc(%arg0: i32, %arg1: i32, %arg2: memref<8x32xf32, #tpu.memory_space<vmem>>, %arg3: memref<1x32xf32, #tpu.memory_space<vmem>>, %arg4: memref<1x32xf32, #tpu.memory_space<vmem>>, %arg5: memref<32x128xbf16, #tpu.memory_space<vmem>>, %arg6: memref<1x128xf32, #tpu.memory_space<vmem>>, %arg7: memref<128x32xbf16, #tpu.memory_space<vmem>>, %arg8: memref<1x32xf32, #tpu.memory_space<vmem>>, %arg9: memref<8x32xf32, #tpu.memory_space<vmem>>, %arg10: memref<8x32xbf16, #tpu.memory_space<vmem>>) attributes {dimension_semantics = [#tpu.dimension_semantics<parallel>, #tpu.dimension_semantics<arbitrary>], iteration_bounds = array<i64: 1, 1>, scalar_prefetch = 0 : i64, scratch_operands = 1 : i64, tpu.core_type = #tpu.core_type<tc>, window_params = [{transform_indices = @transform_0, window_bounds = array<i64: 8, 32>}, {pipeline_mode = #tpu.pipeline_mode<synchronous>, transform_indices = @transform_1, window_bounds = array<i64: 1, 32>}, {pipeline_mode = #tpu.pipeline_mode<synchronous>, transform_indices = @transform_2, window_bounds = array<i64: 1, 32>}, {transform_indices = @transform_3, window_bounds = array<i64: 32, 128>}, {transform_indices = @transform_4, window_bounds = array<i64: 1, 128>}, {transform_indices = @transform_5, window_bounds = array<i64: 128, 32>}, {pipeline_mode = #tpu.pipeline_mode<synchronous>, transform_indices = @transform_6, window_bounds = array<i64: 1, 32>}, {transform_indices = @transform_7, window_bounds = array<i64: 8, 32>}]} {
    %c0_i32 = arith.constant 0 : i32
    %0 = arith.cmpi eq, %arg1, %c0_i32 : i32
    %1 = arith.extui %0 : i1 to i32
    %c0_i32_0 = arith.constant 0 : i32
    %2 = arith.cmpi ne, %1, %c0_i32_0 : i32
    scf.if %2 {
      %c0_14 = arith.constant 0 : index
      %c0_15 = arith.constant 0 : index
      %17 = vector.load %arg2[%c0_14, %c0_15] : memref<8x32xf32, #tpu.memory_space<vmem>>, vector<8x32xf32>
      %cst_16 = arith.constant dense<0.000000e+00> : vector<8xf32>
      %18 = vector.multi_reduction <add>, %17, %cst_16 [1] : vector<8x32xf32> to vector<8xf32>
      %19 = vector.shape_cast %18 : vector<8xf32> to vector<8x1xf32>
      %cst_17 = arith.constant 3.200000e+01 : f32
      %20 = vector.broadcast %cst_17 : f32 to vector<8x1xf32>
      %21 = arith.divf %19, %20 : vector<8x1xf32>
      %22 = vector.broadcast %21 : vector<8x1xf32> to vector<8x32xf32>
      %23 = arith.subf %17, %22 : vector<8x32xf32>
      %24 = arith.mulf %23, %23 : vector<8x32xf32>
      %cst_18 = arith.constant dense<0.000000e+00> : vector<8xf32>
      %25 = vector.multi_reduction <add>, %24, %cst_18 [1] : vector<8x32xf32> to vector<8xf32>
      %26 = vector.shape_cast %25 : vector<8xf32> to vector<8x1xf32>
      %cst_19 = arith.constant 3.200000e+01 : f32
      %27 = vector.broadcast %cst_19 : f32 to vector<8x1xf32>
      %28 = arith.divf %26, %27 : vector<8x1xf32>
      %cst_20 = arith.constant 9.99999974E-6 : f32
      %29 = vector.broadcast %cst_20 : f32 to vector<8x1xf32>
      %30 = arith.addf %28, %29 : vector<8x1xf32>
      %31 = math.rsqrt %30 : vector<8x1xf32>
      %32 = vector.broadcast %31 : vector<8x1xf32> to vector<8x32xf32>
      %33 = arith.mulf %23, %32 : vector<8x32xf32>
      %c0_21 = arith.constant 0 : index
      %c0_22 = arith.constant 0 : index
      %34 = vector.load %arg3[%c0_21, %c0_22] : memref<1x32xf32, #tpu.memory_space<vmem>>, vector<1x32xf32>
      %35 = vector.broadcast %34 : vector<1x32xf32> to vector<8x32xf32>
      %36 = arith.mulf %33, %35 : vector<8x32xf32>
      %c0_23 = arith.constant 0 : index
      %c0_24 = arith.constant 0 : index
      %37 = vector.load %arg4[%c0_23, %c0_24] : memref<1x32xf32, #tpu.memory_space<vmem>>, vector<1x32xf32>
      %38 = vector.broadcast %37 : vector<1x32xf32> to vector<8x32xf32>
      %39 = arith.addf %36, %38 : vector<8x32xf32>
      %40 = arith.truncf %39 : vector<8x32xf32> to vector<8x32xbf16>
      %c0_25 = arith.constant 0 : index
      %c0_26 = arith.constant 0 : index
      %41 = vector.load %arg10[%c0_25, %c0_26] : memref<8x32xbf16, #tpu.memory_space<vmem>>, vector<8x32xbf16>
      tpu.vector_store %arg10[%c0_25, %c0_26], %40 {strides = array<i32>} : memref<8x32xbf16, #tpu.memory_space<vmem>>, vector<8x32xbf16>,
      %c0_27 = arith.constant 0 : index
      %c0_28 = arith.constant 0 : index
      %42 = vector.load %arg8[%c0_27, %c0_28] : memref<1x32xf32, #tpu.memory_space<vmem>>, vector<1x32xf32>
      %43 = vector.broadcast %42 : vector<1x32xf32> to vector<8x32xf32>
      %44 = arith.addf %17, %43 : vector<8x32xf32>
      %c0_29 = arith.constant 0 : index
      %c0_30 = arith.constant 0 : index
      %45 = vector.load %arg9[%c0_29, %c0_30] : memref<8x32xf32, #tpu.memory_space<vmem>>, vector<8x32xf32>
      tpu.vector_store %arg9[%c0_29, %c0_30], %44 {strides = array<i32>} : memref<8x32xf32, #tpu.memory_space<vmem>>, vector<8x32xf32>,
    } else {
    }
    %c0 = arith.constant 0 : index
    %c0_1 = arith.constant 0 : index
    %3 = vector.load %arg9[%c0, %c0_1] : memref<8x32xf32, #tpu.memory_space<vmem>>, vector<8x32xf32>
    %c0_2 = arith.constant 0 : index
    %c0_3 = arith.constant 0 : index
    %4 = vector.load %arg10[%c0_2, %c0_3] : memref<8x32xbf16, #tpu.memory_space<vmem>>, vector<8x32xbf16>
    %c0_4 = arith.constant 0 : index
    %c0_5 = arith.constant 0 : index
    %5 = vector.load %arg5[%c0_4, %c0_5] : memref<32x128xbf16, #tpu.memory_space<vmem>>, vector<32x128xbf16>
    %cst = arith.constant dense<0.000000e+00> : vector<8x128xf32>
    %6 = tpu.matmul %4, %5, %cst {dimension_numbers = #tpu.dot_dimension_numbers<[1], [0], [0], [1], [0, 0, 1, 1], [], []>} : vector<8x32xbf16>, vector<32x128xbf16>, vector<8x128xf32> -> vector<8x128xf32>
    %c0_6 = arith.constant 0 : index
    %c0_7 = arith.constant 0 : index
    %7 = vector.load %arg6[%c0_6, %c0_7] : memref<1x128xf32, #tpu.memory_space<vmem>>, vector<1x128xf32>
    %8 = vector.broadcast %7 : vector<1x128xf32> to vector<8x128xf32>
    %9 = arith.addf %6, %8 : vector<8x128xf32>
    %cst_8 = arith.constant 0.000000e+00 : f32
    %10 = vector.broadcast %cst_8 : f32 to vector<8x128xf32>
    %11 = arith.maximumf %9, %10 : vector<8x128xf32>
    %12 = arith.truncf %11 : vector<8x128xf32> to vector<8x128xbf16>
    %c0_9 = arith.constant 0 : index
    %c0_10 = arith.constant 0 : index
    %13 = vector.load %arg7[%c0_9, %c0_10] : memref<128x32xbf16, #tpu.memory_space<vmem>>, vector<128x32xbf16>
    %cst_11 = arith.constant dense<0.000000e+00> : vector<8x32xf32>
    %14 = tpu.matmul %12, %13, %cst_11 {dimension_numbers = #tpu.dot_dimension_numbers<[1], [0], [0], [1], [0, 0, 1, 1], [], []>} : vector<8x128xbf16>, vector<128x32xbf16>, vector<8x32xf32> -> vector<8x32xf32>
    %15 = arith.addf %3, %14 : vector<8x32xf32>
    %c0_12 = arith.constant 0 : index
    %c0_13 = arith.constant 0 : index
    %16 = vector.load %arg9[%c0_12, %c0_13] : memref<8x32xf32, #tpu.memory_space<vmem>>, vector<8x32xf32>
    tpu.vector_store %arg9[%c0_12, %c0_13], %15 {strides = array<i32>} : memref<8x32xf32, #tpu.memory_space<vmem>>, vector<8x32xf32>,
    return
  }
  func.func @transform_0(%arg0: i32, %arg1: i32) -> (i32, i32) {
    %c0_i32 = arith.constant 0 : i32
    %c0_i32_0 = arith.constant 0 : i32
    return %arg0, %c0_i32 : i32, i32
  }
  func.func @transform_1(%arg0: i32, %arg1: i32) -> (i32, i32) {
    %c0_i32 = arith.constant 0 : i32
    %c0_i32_0 = arith.constant 0 : i32
    %c0_i32_1 = arith.constant 0 : i32
    return %c0_i32, %c0_i32_0 : i32, i32
  }
  func.func @transform_2(%arg0: i32, %arg1: i32) -> (i32, i32) {
    %c0_i32 = arith.constant 0 : i32
    %c0_i32_0 = arith.constant 0 : i32
    %c0_i32_1 = arith.constant 0 : i32
    return %c0_i32, %c0_i32_0 : i32, i32
  }
  func.func @transform_3(%arg0: i32, %arg1: i32) -> (i32, i32) {
    %c0_i32 = arith.constant 0 : i32
    %c0_i32_0 = arith.constant 0 : i32
    return %c0_i32, %arg1 : i32, i32
  }
  func.func @transform_4(%arg0: i32, %arg1: i32) -> (i32, i32) {
    %c0_i32 = arith.constant 0 : i32
    %c0_i32_0 = arith.constant 0 : i32
    return %c0_i32, %arg1 : i32, i32
  }
  func.func @transform_5(%arg0: i32, %arg1: i32) -> (i32, i32) {
    %c0_i32 = arith.constant 0 : i32
    %c0_i32_0 = arith.constant 0 : i32
    return %arg1, %c0_i32 : i32, i32
  }
  func.func @transform_6(%arg0: i32, %arg1: i32) -> (i32, i32) {
    %c0_i32 = arith.constant 0 : i32
    %c0_i32_0 = arith.constant 0 : i32
    %c0_i32_1 = arith.constant 0 : i32
    return %c0_i32, %c0_i32_0 : i32, i32
  }
  func.func @transform_7(%arg0: i32, %arg1: i32) -> (i32, i32) {
    %c0_i32 = arith.constant 0 : i32
    %c0_i32_0 = arith.constant 0 : i32
    return %arg0, %c0_i32 : i32, i32
  }
}

</mosaic_0001>

<bundles_post_ra>
// kernel: tpu_custom_call.1
= control target key start
LH: loop header
LB: loop body
LE: loop exit
PB: predicated region body
PF: predicated region fallthrough
CT: control target
= control target key end

     0   :  { %vm33_vm0 = vcmask 261120   ;;  %s466_s0 = inlined_call_operand.vmem [shape: f32[8,32], index: 0, kind: input, shape index: {}]   ;;  %s467_s1 = inlined_call_operand.vmem [shape: f32[1,32], index: 1, kind: input, shape index: {}]   ;;  %s468_s2 = inlined_call_operand.vmem [shape: f32[1,32], index: 2, kind: input, shape index: {}]   ;;  %s469_s3 = inlined_call_operand.vmem [shape: bf16[32,128], index: 3, kind: input, shape index: {}]   ;;  %s470_s4 = inlined_call_operand.vmem [shape: f32[1,128], index: 4, kind: input, shape index: {}]   ;;  %s471_s5 = inlined_call_operand.vmem [shape: bf16[128,32], index: 5, kind: input, shape index: {}]   ;;  %s472_s6 = inlined_call_operand.vmem [shape: f32[1,32], index: 6, kind: input, shape index: {}]   ;;  %s473_s7 = inlined_call_operand.hbm [shape: f32[8,32], index: 7, kind: output, shape index: {}]  }
   0x1   :  { %v32_v0 = vld [vmem:[%s466_s0] sm:$0xff] }
   0x2   :  { %v269_v1 = vld [vmem:[%s472_s6] ss:$0 sm:$0xff]  ;;  %v34_v2 = vsel %vm33_vm0, %v32_v0, 0.0 }
   0x3   :  { %v74_v3 = vadd.f32 %v269_v1, %v32_v0  ;;  %35 = vadd.xlane.f32.xlu0 %v34_v2 }
   0x5   :  { %75 = vst.msk [vmem:[#allocation3] sm:$0xff] %vm33_vm0, %v74_v3 }
   0x6   :  { %12 = vsyncpa [#allocation4], 0  ;;  %v325_v9 = vld [vmem:[%s469_s3] sm:$0xff]   ;;  %v361_v10 = vmov 0.0   ;;  %v326_v11 = vld [vmem:[%s469_s3 + $0x8] sm:$0xff]   ;;  %vm362_vm1 = vmmov 0  }
   0x7   :  { %294 = vmatprep.subr.bf16.mxu0 %v361_v10  ;;  %302 = vmatprep.subr.bf16.mxu1 %v361_v10  ;;  %v327_v12 = vld [vmem:[%s471_s5] sm:$0xff]   ;;  %v328_v13 = vld [vmem:[%s471_s5 + $0x8] sm:$0xff]   ;;  %v329_v14 = vld [vmem:[%s471_s5 + $0x10] sm:$0xff]   ;;  %vm65_vm2 = vcmask 257024   ;;  %s363_s26 = smov [#allocation3]  }
   0x8   :  { %295 = vmatpush3.bf16.msra.mxu0 %v325_v9  ;;  %298 = vmatprep.mubr.msk.bf16.mxu0 %vm362_vm1, %v361_v10  ;;  %v330_v15 = vld [vmem:[%s471_s5 + $0x18] sm:$0xff]   ;;  %v331_v16 = vld [vmem:[%s471_s5 + $0x20] sm:$0xff]   ;;  %v332_v17 = vld [vmem:[%s471_s5 + $0x28] sm:$0xff]   ;;  %s259_s27 = sshll.u32 %s363_s26, 4  ;;  %s260_s27 = int_to_ptr.vmem [resolvable:$true] %s259_s27 }
   0x9   :  { %296 = vmatprep.subr.bf16.mxu0 %v361_v10  ;;  %318 = vmatprep.mubr.msk.bf16.mxu1 %vm362_vm1, %v361_v10  ;;  %v267_v22 = vld [vmem:[%s467_s1] ss:$0 sm:$0xff]  ;;  %v333_v29 = vld [vmem:[%s471_s5 + $0x30] sm:$0xff]   ;;  %v334_v30 = vld [vmem:[%s471_s5 + $0x38] sm:$0xff]   ;;  %p342_p1 = scmp.lt.s32.totalorder %s260_s27, %s260_s27 }
   0xa   :  { %303 = vmatpush3.bf16.msra.mxu1 %v327_v12  ;;  %v268_v24 = vld [vmem:[%s468_s2] ss:$0 sm:$0xff] }
   0xb   :  { %304 = vmatprep.subr.bf16.mxu1 %v361_v10  ;;  %v270_v31 = vld [vmem:[%s470_s4] ss:$0 sm:$0xff]  ;;  %s337_s4 = scalar_lea.vmem %s260_s27, 128 }
   0xc   :  { %297 = vmatpush3.bf16.msra.mxu0 %v326_v11  ;;  %v76_v39 = vld [vmem:[#allocation3] sm:$0xff]  ;;  %p338_p0 = scmp.ne.s32.totalorder %s260_s27, %s337_s4  ;;  %p343_p2 = scmp.lt.s32.totalorder %s337_s4, %s337_s4 }
   0xe   :  { %305 = vmatpush3.bf16.msra.mxu1 %v328_v13  ;;  %p344_p3 = por %p343_p2, %p342_p1 }
   0xf   :  { %306 = vmatprep.subr.bf16.mxu1 %v361_v10 }
  0x10   :  { %p345_p4 = pnand %p344_p3, %p338_p0 }
  0x12   :  { %307 = vmatpush3.bf16.msra.mxu1 %v329_v14 }
  0x13   :  { %308 = vmatprep.subr.bf16.mxu1 %v361_v10 }
  0x16   :  { %309 = vmatpush3.bf16.msra.mxu1 %v330_v15 }
  0x17   :  { %310 = vmatprep.subr.bf16.mxu1 %v361_v10 }
  0x1a   :  { %311 = vmatpush3.bf16.msra.mxu1 %v331_v16 }
  0x1b   :  { %312 = vmatprep.subr.bf16.mxu1 %v361_v10 }
  0x1e   :  { %313 = vmatpush3.bf16.msra.mxu1 %v332_v17 }
  0x1f   :  { %314 = vmatprep.subr.bf16.mxu1 %v361_v10 }
  0x22   :  { %315 = vmatpush3.bf16.msra.mxu1 %v333_v29 }
  0x23   :  { %316 = vmatprep.subr.bf16.mxu1 %v361_v10 }
  0x26   :  { %317 = vmatpush3.bf16.msra.mxu1 %v334_v30 }
  0x90   :  { %v36_v4 = vpop.xlane.xlu0 %35 }
  0x91   :  { %v38_v5 = vmul.f32 0.03125, %v36_v4 }
  0x93   :  { %v39_v6 = vsub.f32 %v32_v0, %v38_v5 }
  0x95   :  { %v40_v7 = vmul.f32 %v39_v6, %v39_v6 }
  0x97   :  { %v41_v8 = vsel %vm33_vm0, %v40_v7, 0.0 }
  0x98   :  { %42 = vadd.xlane.f32.xlu0 %v41_v8 }
 0x125   :  { %v43_v18 = vpop.xlane.xlu0 %42 }
 0x126   :  { %v44_v19 = vmul.f32 0.03125, %v43_v18 }
 0x128   :  { %v45_v20 = vadd.f32 1e-05, %v44_v19 }
 0x12a   :  { %335 = vrsqrt.f32 %v45_v20 }
 0x134   :  { %v336_v21 = vpop.eup %335 }
 0x135   :  { %v47_v23 = vmul.f32 %v336_v21, %v39_v6 }
 0x137   :  { %v55_v25 = vmul.f32 %v267_v22, %v47_v23 }
 0x139   :  { %v63_v26 = vadd.f32 %v268_v24, %v55_v25 }
 0x13b   :  { %v64_v27 = vpack.c.bf16 %v63_v26, %v63_v26 }
 0x13d   :  { %66 = vst.msk [vmem:[#allocation2] sm:$0xf] %vm65_vm2, %v64_v27 }
 0x144   :  { %v77_v28 = vld [vmem:[#allocation2] sm:$0xf] }
 0x145   :  { %299 = vmatmul.mubr.msk.bf16.vlgmr.msra.gmra.mrb[0].mxu0 %vm33_vm0, %v77_v28 }
 0x218   :  { %v139_v32 = vpop.f32.mrb[0].mxu0 }
 0x219   :  { %v140_v33 = vadd.f32 %v270_v31, %v139_v32  ;;  %v300_v34 = vpop.f32.mrb[1].mxu0 }
 0x21a   :  { %v142_v35 = vpop.f32.mrb[2].mxu0 }
 0x21b   :  { %v145_v36 = vmax.f32 %v140_v33, 0.0  ;;  %v301_v37 = vpop.f32.mrb[3].mxu0 }
 0x21d   :  { %v146_v38 = vpack.c.bf16 %v145_v36, %v145_v36 }
 0x21f   :  { %319 = vmatmul.mubr.bf16.vlgmr.msra.gmra.mrb[0].mxu1 %v146_v38 }
 0x2f2   :  { %v245_v40 = vpop.f32.mrb[0].mxu1 }
 0x2f3   :  { %v251_v41 = vadd.f32 %v245_v40, %v76_v39  ;;  %v320_v42 = vpop.f32.mrb[1].mxu1 }
 0x2f4   :  { %v248_v43 = vpop.f32.mrb[2].mxu1 }
 0x2f5   :  { %252 = vst.msk [vmem:[#allocation3] sm:$0xff] %vm33_vm0, %v251_v41  ;;  %v321_v44 = vpop.f32.mrb[3].mxu1 }
 0x2f6   :  { %348 = shalt.err (!%p345_p4)
}
 0x2f7   :  { %s349_s28 = scalar_lea.hbm %s473_s7, 128 }
 0x2f8   :  { %p350_p5 = scmp.ne.s32.totalorder %s473_s7, %s349_s28  ;;  %p353_p6 = scmp.lt.u32.totalorder %s349_s28, %s473_s7 }
 0x2fa   :  { %p355_p7 = pnand %p353_p6, %p350_p5 }
 0x2fc   :  { %358 = shalt.err (!%p355_p7)
}
 0x2fd   :  { %262 = dma.vmem_to_hbm [thread:$0]  %s260_s27, 128, %s473_s7, [#allocation4]  }
 0x2fe   :  { %359 = dma.done.wait [#allocation4], 128  }
 0x2ff   :  { %360 = vsyncadd [#allocation4], 4294967168 }
 0x300   :  { %266 = vsyncpa [#allocation4], 1 }

</bundles_post_ra>
